<compile_context>
chip_gen: v7x
topology: tpu7x:2x2x1
jax: 0.10.0
libtpu: 0.0.40
codegen_flags: <defaults>
</compile_context>

<pallas_src>
import functools

import jax
import jax.numpy as jnp
from jax import lax
from jax.experimental import pallas as pl
from jax.experimental.pallas import tpu as pltpu

LANES = 128
MIN_BLOCK = 8 * LANES            # one (8,128) f32 tile = 1024 elements
MAX_TILE_ROWS = 8192             # 8192 x 128 f32 = 4 MiB per input buffer
CHUNK_ROWS = 64                  # in-kernel accumulation chunk (8 f32 vregs/input)
VMEM_LIMIT_BYTES = 32 * 1024 * 1024
SMALL_INPUT_NUMEL = 1 << 20      # below this, pure-JAX reference path is faster


def _detect_num_splits():
    """1 on single-TensorCore chips (v5e/v6e); >1 only if the device says so."""
    try:
        n = int(getattr(jax.devices()[0], "num_cores", 1))
        return max(1, min(2, n))
    except Exception:
        return 1


def _tile_partial_sums(x_ref, t_ref, activation_fn, n_rows, tail_valid):
    """Partial sums (sum(p*t), sum(p), sum(t)) over the first `n_rows` rows of
    the current tile, each reduced to an (8,128) f32 block.

    `n_rows` (multiple of 8) and `tail_valid` are static Python values.  If
    `tail_valid` is not None, only the first `tail_valid` elements of the final
    8-row group are valid (zero-padding there must not leak activation(0))."""

    def chunk_sums(x_raw, t_raw):
        p = activation_fn(x_raw.astype(jnp.float32))
        t = t_raw.astype(jnp.float32)
        g = x_raw.shape[0] // 8
        p3 = p.reshape(g, 8, LANES)
        t3 = t.reshape(g, 8, LANES)
        # Reduce the leading axis: pure element-wise VPU adds, no XLU reduce.
        return (jnp.sum(p3 * t3, axis=0),
                jnp.sum(p3, axis=0),
                jnp.sum(t3, axis=0))

    zero = jnp.zeros((8, LANES), jnp.float32)
    pt = ps = ts = zero

    n_unmasked = n_rows - (8 if tail_valid is not None else 0)
    full_chunks = n_unmasked // CHUNK_ROWS
    rem_rows = n_unmasked % CHUNK_ROWS          # multiple of 8

    if full_chunks > 0:
        def body(c, carry):
            cpt, cps, cts = carry
            r0 = pl.multiple_of(c * CHUNK_ROWS, CHUNK_ROWS)
            dpt, dps, dts = chunk_sums(x_ref[pl.ds(r0, CHUNK_ROWS), :],
                                       t_ref[pl.ds(r0, CHUNK_ROWS), :])
            return (cpt + dpt, cps + dps, cts + dts)
        pt, ps, ts = lax.fori_loop(0, full_chunks, body, (pt, ps, ts), unroll=2)

    if rem_rows > 0:
        r0 = full_chunks * CHUNK_ROWS
        dpt, dps, dts = chunk_sums(x_ref[pl.ds(r0, rem_rows), :],
                                   t_ref[pl.ds(r0, rem_rows), :])
        pt, ps, ts = pt + dpt, ps + dps, ts + dts

    if tail_valid is not None:
        # One-vreg mask, block-local indices only (no int32 overflow risk).
        r0 = n_unmasked
        x = x_ref[pl.ds(r0, 8), :].astype(jnp.float32)
        t = t_ref[pl.ds(r0, 8), :].astype(jnp.float32)
        row = lax.broadcasted_iota(jnp.int32, (8, LANES), 0)
        lane = lax.broadcasted_iota(jnp.int32, (8, LANES), 1)
        mask = (row * LANES + lane) < tail_valid
        p = jnp.where(mask, activation_fn(x), 0.0)
        t = jnp.where(mask, t, 0.0)
        pt = pt + p * t
        ps = ps + p
        ts = ts + t

    return pt, ps, ts


def _make_kernel(activation_fn, *, tile_rows, n_blocks, blocks_per_split,
                 last_block_rows, tail_valid, num_splits):
    # Fast path: no padding and a full last block -> single unmasked path,
    # no interior/last pl.when split is generated at all.
    needs_last_special = (last_block_rows != tile_rows) or (tail_valid is not None)
    has_phantom = (num_splits > 1) and (n_blocks % num_splits != 0)

    def kernel(x_ref, t_ref, pt_ref, ps_ref, ts_ref):
        if num_splits > 1:
            i = pl.program_id(1)                       # block index within split
            b = pl.program_id(0) * blocks_per_split + i  # global block index
        else:
            i = pl.program_id(0)
            b = i

        @pl.when(i == 0)
        def _():
            pt_ref[...] = jnp.zeros_like(pt_ref)
            ps_ref[...] = jnp.zeros_like(ps_ref)
            ts_ref[...] = jnp.zeros_like(ts_ref)

        def accumulate(n_rows, tail):
            pt, ps, ts = _tile_partial_sums(x_ref, t_ref, activation_fn,
                                            n_rows, tail)
            pt_ref[...] += pt
            ps_ref[...] += ps
            ts_ref[...] += ts

        if not needs_last_special:
            if has_phantom:
                # Phantom blocks (only with num_splits>1 and odd n_blocks) are
                # clamped to the last real block by the index_map; gate them.
                @pl.when(b < n_blocks)
                def _():
                    accumulate(tile_rows, None)
            else:
                accumulate(tile_rows, None)
        else:
            if n_blocks > 1:
                @pl.when(b < n_blocks - 1)
                def _():
                    accumulate(tile_rows, None)

            @pl.when(b == n_blocks - 1)
            def _():
                accumulate(last_block_rows, tail_valid)
            # Phantom blocks fall through both gates and contribute nothing.

    return kernel


def tversky_loss(inputs, targets, activation_fn=jax.nn.sigmoid,
                 smooth=1.0, alpha=0.5, beta=0.5, *,
                 num_splits=None, max_tile_rows=MAX_TILE_ROWS,
                 min_pallas_numel=SMALL_INPUT_NUMEL):
    """Matches TverskyLoss.forward(inputs, targets, activation_fn, ...)."""
    x = inputs.reshape(-1)
    t = targets.reshape(-1)
    n = x.shape[0]

    if n < min_pallas_numel:
        # Small-input fallback: pallas_call fixed cost dominates at this size
        # and XLA's fused reduction is already at roofline.
        p = activation_fn(x.astype(jnp.float32))
        tf = t.astype(jnp.float32)
        TP = jnp.sum(p * tf)
        FP = jnp.sum(p) - TP
        FN = jnp.sum(tf) - TP
        return 1.0 - (TP + smooth) / (TP + alpha * FP + beta * FN + smooth)

    # Pad (<=1023 elements) only when numel is not a multiple of 8*128; the
    # common case is a free reshape with no extra HBM copy.
    n_pad = pl.cdiv(n, MIN_BLOCK) * MIN_BLOCK
    if n_pad != n:
        x = jnp.pad(x, (0, n_pad - n))
        t = jnp.pad(t, (0, n_pad - n))

    rows = n_pad // LANES                        # multiple of 8
    tile_rows = min(max_tile_rows, rows)
    tile_rows = max(8, tile_rows - tile_rows % 8)
    n_blocks = pl.cdiv(rows, tile_rows)
    last_block_rows = rows - (n_blocks - 1) * tile_rows
    # The zero-padded region (if any) lives entirely in the final 8-row group.
    tail_valid = None if n_pad == n else (n - (rows - 8) * LANES)

    if num_splits is None:
        num_splits = _detect_num_splits()
    num_splits = max(1, min(int(num_splits), n_blocks))
    blocks_per_split = pl.cdiv(n_blocks, num_splits) if num_splits > 1 else n_blocks

    x2 = x.reshape(rows, LANES)
    t2 = t.reshape(rows, LANES)

    if num_splits == 1:
        grid = (n_blocks,)
        in_spec = pl.BlockSpec((tile_rows, LANES), lambda i: (i, 0))
        acc_spec = pl.BlockSpec((8, LANES), lambda i: (0, 0))
        dim_sem = ("arbitrary",)
    else:
        grid = (num_splits, blocks_per_split)

        def in_map(c, i):
            # Clamp phantom blocks into range; the kernel gates them out.
            return (jnp.minimum(c * blocks_per_split + i, n_blocks - 1), 0)

        in_spec = pl.BlockSpec((tile_rows, LANES), in_map)
        acc_spec = pl.BlockSpec((8, LANES), lambda c, i: (c, 0))
        dim_sem = ("parallel", "arbitrary")

    acc_shape = jax.ShapeDtypeStruct((num_splits * 8, LANES), jnp.float32)

    kernel = _make_kernel(activation_fn, tile_rows=tile_rows, n_blocks=n_blocks,
                          blocks_per_split=blocks_per_split,
                          last_block_rows=last_block_rows, tail_valid=tail_valid,
                          num_splits=num_splits)

    bytes_accessed = (n_pad * (x.dtype.itemsize + t.dtype.itemsize)
                      + 3 * num_splits * 8 * LANES * 4)
    cost = pl.CostEstimate(flops=5 * n_pad, transcendentals=n_pad,
                           bytes_accessed=bytes_accessed)

    pt_acc, p_acc, t_acc = pl.pallas_call(
        kernel,
        out_shape=(acc_shape, acc_shape, acc_shape),
        grid=grid,
        in_specs=[in_spec, in_spec],
        out_specs=(acc_spec, acc_spec, acc_spec),
        compiler_params=pltpu.CompilerParams(
            dimension_semantics=dim_sem,
            vmem_limit_bytes=VMEM_LIMIT_BYTES),
        cost_estimate=cost,
    )(x2, t2)

    TP = jnp.sum(pt_acc)
    FP = jnp.sum(p_acc) - TP
    FN = jnp.sum(t_acc) - TP
    tversky = (TP + smooth) / (TP + alpha * FP + beta * FN + smooth)
    return 1.0 - tversky


def _reference(inputs, targets, activation_fn=jax.nn.sigmoid,
               smooth=1.0, alpha=0.5, beta=0.5):
    p = activation_fn(inputs.astype(jnp.float32)).reshape(-1)
    t = targets.astype(jnp.float32).reshape(-1)
    TP = jnp.sum(p * t)
    FP = jnp.sum((1.0 - t) * p)
    FN = jnp.sum(t * (1.0 - p))
    return 1.0 - (TP + smooth) / (TP + alpha * FP + beta * FN + smooth)


if __name__ == "__main__":
    key = jax.random.PRNGKey(0)
    keys = jax.random.split(key, 6)

    def check(shape, kx, kt, **kw):
        x = jax.random.normal(kx, shape, dtype=jnp.float32)       # logits
        t = (jax.random.uniform(kt, shape) > 0.5).astype(jnp.float32)
        fn = jax.jit(functools.partial(
            tversky_loss, activation_fn=jax.nn.sigmoid,
            min_pallas_numel=0,            # force the Pallas kernel path
            **kw))
        loss = fn(x, t)
        jax.block_until_ready(loss)
        ref = _reference(x, t)
        assert jnp.allclose(loss, ref, atol=1e-5, rtol=1e-4), (shape, loss, ref)

    # NCHW, same convention as the PyTorch module's typical usage.
    # 1) Aligned numel (2048): fast single-block unmasked path.
    check((2, 4, 16, 16), keys[0], keys[1])
    # 2) Ragged numel (3315): exercises the one-vreg tail mask.
    check((3, 5, 17, 13), keys[2], keys[3])
    # 3) Multi-block with 2-way split + phantom-block gating (n_blocks=3).
    check((2, 6, 16, 16), keys[4], keys[5], max_tile_rows=8, num_splits=2)

    print("KERNEL_OK")
</pallas_src>

<mosaic_0001>
module attributes {stable_mosaic.version = 11 : i64} {
  func.func @kernel(%arg0: i32, %arg1: memref<16x128xf32, #tpu.memory_space<vmem>>, %arg2: memref<16x128xf32, #tpu.memory_space<vmem>>, %arg3: memref<8x128xf32, #tpu.memory_space<vmem>>, %arg4: memref<8x128xf32, #tpu.memory_space<vmem>>, %arg5: memref<8x128xf32, #tpu.memory_space<vmem>>) attributes {dimension_semantics = [#tpu.dimension_semantics<arbitrary>], iteration_bounds = array<i64: 1>, scalar_prefetch = 0 : i64, scratch_operands = 0 : i64, tpu.core_type = #tpu.core_type<tc>, window_params = [{transform_indices = @transform_0, window_bounds = array<i64: 16, 128>}, {transform_indices = @transform_1, window_bounds = array<i64: 16, 128>}, {pipeline_mode = #tpu.pipeline_mode<synchronous>, transform_indices = @transform_2, window_bounds = array<i64: 8, 128>}, {pipeline_mode = #tpu.pipeline_mode<synchronous>, transform_indices = @transform_3, window_bounds = array<i64: 8, 128>}, {pipeline_mode = #tpu.pipeline_mode<synchronous>, transform_indices = @transform_4, window_bounds = array<i64: 8, 128>}]} {
    %c0_i32 = arith.constant 0 : i32
    %0 = arith.cmpi eq, %arg0, %c0_i32 : i32
    %1 = arith.extui %0 : i1 to i32
    %c0_i32_0 = arith.constant 0 : i32
    %2 = arith.cmpi ne, %1, %c0_i32_0 : i32
    scf.if %2 {
      %cst_20 = arith.constant 0.000000e+00 : f32
      %29 = vector.broadcast %cst_20 : f32 to vector<8x128xf32>
      %c0_21 = arith.constant 0 : index
      %c0_22 = arith.constant 0 : index
      %30 = vector.load %arg3[%c0_21, %c0_22] : memref<8x128xf32, #tpu.memory_space<vmem>>, vector<8x128xf32>
      tpu.vector_store %arg3[%c0_21, %c0_22], %29 {strides = array<i32>} : memref<8x128xf32, #tpu.memory_space<vmem>>, vector<8x128xf32>,
      %cst_23 = arith.constant 0.000000e+00 : f32
      %31 = vector.broadcast %cst_23 : f32 to vector<8x128xf32>
      %c0_24 = arith.constant 0 : index
      %c0_25 = arith.constant 0 : index
      %32 = vector.load %arg4[%c0_24, %c0_25] : memref<8x128xf32, #tpu.memory_space<vmem>>, vector<8x128xf32>
      tpu.vector_store %arg4[%c0_24, %c0_25], %31 {strides = array<i32>} : memref<8x128xf32, #tpu.memory_space<vmem>>, vector<8x128xf32>,
      %cst_26 = arith.constant 0.000000e+00 : f32
      %33 = vector.broadcast %cst_26 : f32 to vector<8x128xf32>
      %c0_27 = arith.constant 0 : index
      %c0_28 = arith.constant 0 : index
      %34 = vector.load %arg5[%c0_27, %c0_28] : memref<8x128xf32, #tpu.memory_space<vmem>>, vector<8x128xf32>
      tpu.vector_store %arg5[%c0_27, %c0_28], %33 {strides = array<i32>} : memref<8x128xf32, #tpu.memory_space<vmem>>, vector<8x128xf32>,
    } else {
    }
    %cst = arith.constant 0.000000e+00 : f32
    %3 = vector.broadcast %cst : f32 to vector<8x128xf32>
    %c0 = arith.constant 0 : index
    %c0_1 = arith.constant 0 : index
    %4 = vector.load %arg1[%c0, %c0_1] : memref<16x128xf32, #tpu.memory_space<vmem>>, vector<16x128xf32>
    %c0_2 = arith.constant 0 : index
    %c0_3 = arith.constant 0 : index
    %5 = vector.load %arg2[%c0_2, %c0_3] : memref<16x128xf32, #tpu.memory_space<vmem>>, vector<16x128xf32>
    %6 = arith.negf %4 : vector<16x128xf32>
    %7 = math.exp %6 : vector<16x128xf32>
    %cst_4 = arith.constant 1.000000e+00 : f32
    %8 = vector.broadcast %cst_4 : f32 to vector<16x128xf32>
    %9 = arith.addf %8, %7 : vector<16x128xf32>
    %10 = arith.divf %8, %9 : vector<16x128xf32>
    %11 = vector.shape_cast %10 : vector<16x128xf32> to vector<2x8x128xf32>
    %12 = vector.shape_cast %5 : vector<16x128xf32> to vector<2x8x128xf32>
    %13 = arith.mulf %11, %12 : vector<2x8x128xf32>
    %cst_5 = arith.constant dense<0.000000e+00> : vector<8x128xf32>
    %14 = vector.multi_reduction <add>, %13, %cst_5 [0] : vector<2x8x128xf32> to vector<8x128xf32>
    %cst_6 = arith.constant dense<0.000000e+00> : vector<8x128xf32>
    %15 = vector.multi_reduction <add>, %11, %cst_6 [0] : vector<2x8x128xf32> to vector<8x128xf32>
    %cst_7 = arith.constant dense<0.000000e+00> : vector<8x128xf32>
    %16 = vector.multi_reduction <add>, %12, %cst_7 [0] : vector<2x8x128xf32> to vector<8x128xf32>
    %17 = arith.addf %3, %14 : vector<8x128xf32>
    %18 = arith.addf %3, %15 : vector<8x128xf32>
    %19 = arith.addf %3, %16 : vector<8x128xf32>
    %c0_8 = arith.constant 0 : index
    %c0_9 = arith.constant 0 : index
    %20 = vector.load %arg3[%c0_8, %c0_9] : memref<8x128xf32, #tpu.memory_space<vmem>>, vector<8x128xf32>
    %21 = arith.addf %20, %17 : vector<8x128xf32>
    %c0_10 = arith.constant 0 : index
    %c0_11 = arith.constant 0 : index
    %22 = vector.load %arg3[%c0_10, %c0_11] : memref<8x128xf32, #tpu.memory_space<vmem>>, vector<8x128xf32>
    tpu.vector_store %arg3[%c0_10, %c0_11], %21 {strides = array<i32>} : memref<8x128xf32, #tpu.memory_space<vmem>>, vector<8x128xf32>,
    %c0_12 = arith.constant 0 : index
    %c0_13 = arith.constant 0 : index
    %23 = vector.load %arg4[%c0_12, %c0_13] : memref<8x128xf32, #tpu.memory_space<vmem>>, vector<8x128xf32>
    %24 = arith.addf %23, %18 : vector<8x128xf32>
    %c0_14 = arith.constant 0 : index
    %c0_15 = arith.constant 0 : index
    %25 = vector.load %arg4[%c0_14, %c0_15] : memref<8x128xf32, #tpu.memory_space<vmem>>, vector<8x128xf32>
    tpu.vector_store %arg4[%c0_14, %c0_15], %24 {strides = array<i32>} : memref<8x128xf32, #tpu.memory_space<vmem>>, vector<8x128xf32>,
    %c0_16 = arith.constant 0 : index
    %c0_17 = arith.constant 0 : index
    %26 = vector.load %arg5[%c0_16, %c0_17] : memref<8x128xf32, #tpu.memory_space<vmem>>, vector<8x128xf32>
    %27 = arith.addf %26, %19 : vector<8x128xf32>
    %c0_18 = arith.constant 0 : index
    %c0_19 = arith.constant 0 : index
    %28 = vector.load %arg5[%c0_18, %c0_19] : memref<8x128xf32, #tpu.memory_space<vmem>>, vector<8x128xf32>
    tpu.vector_store %arg5[%c0_18, %c0_19], %27 {strides = array<i32>} : memref<8x128xf32, #tpu.memory_space<vmem>>, vector<8x128xf32>,
    return
  }
  func.func @transform_0(%arg0: i32) -> (i32, i32) {
    %c0_i32 = arith.constant 0 : i32
    %c0_i32_0 = arith.constant 0 : i32
    return %arg0, %c0_i32 : i32, i32
  }
  func.func @transform_1(%arg0: i32) -> (i32, i32) {
    %c0_i32 = arith.constant 0 : i32
    %c0_i32_0 = arith.constant 0 : i32
    return %arg0, %c0_i32 : i32, i32
  }
  func.func @transform_2(%arg0: i32) -> (i32, i32) {
    %c0_i32 = arith.constant 0 : i32
    %c0_i32_0 = arith.constant 0 : i32
    %c0_i32_1 = arith.constant 0 : i32
    return %c0_i32, %c0_i32_0 : i32, i32
  }
  func.func @transform_3(%arg0: i32) -> (i32, i32) {
    %c0_i32 = arith.constant 0 : i32
    %c0_i32_0 = arith.constant 0 : i32
    %c0_i32_1 = arith.constant 0 : i32
    return %c0_i32, %c0_i32_0 : i32, i32
  }
  func.func @transform_4(%arg0: i32) -> (i32, i32) {
    %c0_i32 = arith.constant 0 : i32
    %c0_i32_0 = arith.constant 0 : i32
    %c0_i32_1 = arith.constant 0 : i32
    return %c0_i32, %c0_i32_0 : i32, i32
  }
}

</mosaic_0001>

<bundles_post_ra>
// kernel: tversky_loss.1
= control target key start
LH: loop header
LB: loop body
LE: loop exit
PB: predicated region body
PF: predicated region fallthrough
CT: control target
= control target key end

     0   :  { %s123_s0 = inlined_call_operand.vmem [shape: f32[16,128], index: 0, kind: input, shape index: {}]   ;;  %s124_s1 = inlined_call_operand.vmem [shape: f32[16,128], index: 1, kind: input, shape index: {}]   ;;  %s125_s4 = inlined_call_operand.vmem [shape: f32[8,128], index: 4, kind: output, shape index: {2}]   ;;  %s126_s3 = inlined_call_operand.vmem [shape: f32[8,128], index: 3, kind: output, shape index: {1}]   ;;  %s127_s2 = inlined_call_operand.vmem [shape: f32[8,128], index: 2, kind: output, shape index: {0}]  }
   0x1   :  { %v21_v0 = vld [vmem:[%s123_s0] sm:$0xff]  ;;  %v22_v1 = vld [vmem:[%s123_s0 + $0x8] sm:$0xff] }
   0x2   :  { %v23_v2 = vld [vmem:[%s124_s1] sm:$0xff]  ;;  %v24_v3 = vld [vmem:[%s124_s1 + $0x8] sm:$0xff]  ;;  %v66_v4 = vmul.f32 -1.442695, %v21_v0  ;;  %v67_v5 = vmul.f32 -1.442695, %v22_v1 }
   0x3   :  { %v41_v6 = vadd.f32 %v24_v3, %v23_v2 }
   0x4   :  { %69 = vpow2.f32 %v66_v4 }
   0x5   :  { %71 = vpow2.f32 %v67_v5  ;;  %53 = vst [vmem:[%s125_s4] sm:$0xff] %v41_v6 }
   0xe   :  { %v70_v7 = vpop.eup %69 }
   0xf   :  { %v72_v8 = vpop.eup %71  ;;  %v31_v9 = vadd.f32 1.0, %v70_v7 }
  0x10   :  { %v32_v10 = vadd.f32 1.0, %v72_v8 }
  0x11   :  { %73 = vrcp.f32 %v31_v9 }
  0x12   :  { %75 = vrcp.f32 %v32_v10 }
  0x1b   :  { %v74_v11 = vpop.eup %73 }
  0x1c   :  { %v76_v12 = vpop.eup %75  ;;  %v37_v13 = vmul.f32 %v74_v11, %v23_v2 }
  0x1d   :  { %v38_v14 = vmul.f32 %v76_v12, %v24_v3  ;;  %v40_v15 = vadd.f32 %v76_v12, %v74_v11 }
  0x1f   :  { %v39_v16 = vadd.f32 %v38_v14, %v37_v13  ;;  %50 = vst [vmem:[%s126_s3] sm:$0xff] %v40_v15 }
  0x21   :  { %47 = vst [vmem:[%s127_s2] sm:$0xff] %v39_v16 }

</bundles_post_ra>
